<compile_context>
chip_gen: v7x
topology: tpu7x:2x2x1
jax: 0.10.0
libtpu: 0.0.40
codegen_flags: <defaults>
</compile_context>

<pallas_src>
import jax
import jax.numpy as jnp
from jax.experimental import pallas as pl
from jax.experimental.pallas import tpu as pltpu


def _round_up(x, m):
    return (x + m - 1) // m * m


def _plan_dim(dim, cap, align):
    """Pick (tile, padded_dim) for one array dimension.

    If the dim fits in a single tile, use the full (unpadded) dim as the block
    size (allowed by the (8,128) rule).  Otherwise pad to `align` and pick the
    largest tile <= cap (multiple of `align`) that keeps the extra padding
    small, so we never round a dim up to a whole tile multiple needlessly.
    """
    if dim <= cap:
        return dim, dim
    dp = _round_up(dim, align)
    cap = max(align, cap - cap % align)
    thresh = max(align, dp // 8)          # tolerate at most ~12.5% extra rows/cols
    t = cap
    while t >= align:
        padded = _round_up(dp, t)
        if padded - dim <= thresh:
            return t, padded
        t -= align
    return align, dp


def _ensemble_kernel_f32(x_ref, w_ref, c_ref, o_ref):
    """out tile (f32, resident across K) = x @ W_sum + c; bias folded at k==0."""
    k = pl.program_id(2)
    p = jnp.dot(x_ref[...], w_ref[...], preferred_element_type=jnp.float32)

    @pl.when(k == 0)
    def _():
        o_ref[...] = c_ref[...] + p        # (1, tn) broadcasts over rows

    @pl.when(k != 0)
    def _():
        o_ref[...] += p


def _ensemble_kernel_cast(x_ref, w_ref, c_ref, o_ref, acc_ref):
    """Same as above but with an f32 scratch accumulator and a narrow output."""
    k = pl.program_id(2)
    p = jnp.dot(x_ref[...], w_ref[...], preferred_element_type=jnp.float32)

    @pl.when(k == 0)
    def _():
        acc_ref[...] = c_ref[...] + p

    @pl.when(k != 0)
    def _():
        acc_ref[...] += p

    @pl.when(k == pl.num_programs(2) - 1)
    def _():
        o_ref[...] = acc_ref[...].astype(o_ref.dtype)


def additive_ensemble(x, init_output, W, b, *, tm=1024, tn=1024, tk=512,
                      compute_dtype=jnp.bfloat16, out_dtype=jnp.float32):
    """x: (B, F) f32; init_output: (D,) f32; W: (E, F, D) f32; b: (E, D) f32."""
    B, F = x.shape
    E, F2, D = W.shape
    assert F == F2 and b.shape == (E, D) and init_output.shape == (D,)

    # ---- Algebraic collapse of the affine ensemble (wrapper side, f32) ----
    w_sum = jnp.sum(W, axis=0)                              # (F, D)
    c = (init_output + jnp.sum(b, axis=0)).reshape(1, D)    # (1, D)

    # ---- Tile planning: full dims when they fit, minimal alignment padding otherwise ----
    tm, Bp = _plan_dim(B, tm, 8)
    tn, Dp = _plan_dim(D, tn, 128)
    tk, Fp = _plan_dim(F, tk, 128)

    # v7x megacore: ensure >= 2 parallel output tiles when the batch permits,
    # otherwise one of the two TensorCores sits idle at typical boosting shapes.
    if (Bp // tm) * (Dp // tn) < 2 and B >= 16:
        tm = _round_up((B + 1) // 2, 8)
        Bp = _round_up(B, tm)

    # Cast first (halves materialized/streamed bytes), pad only if needed.
    x_c = x.astype(compute_dtype)
    w_c = w_sum.astype(compute_dtype)
    x_p = x_c if (Bp == B and Fp == F) else jnp.pad(x_c, ((0, Bp - B), (0, Fp - F)))
    w_p = w_c if (Fp == F and Dp == D) else jnp.pad(w_c, ((0, Fp - F), (0, Dp - D)))
    c_p = (c if Dp == D else jnp.pad(c, ((0, 0), (0, Dp - D)))).astype(jnp.float32)

    grid = (Bp // tm, Dp // tn, Fp // tk)   # reduction (K) axis last

    in_specs = [
        pl.BlockSpec((tm, tk), lambda i, j, k: (i, k)),   # x tile
        pl.BlockSpec((tk, tn), lambda i, j, k: (k, j)),   # W_sum tile
        pl.BlockSpec((1, tn), lambda i, j, k: (0, j)),    # folded bias
    ]
    out_spec = pl.BlockSpec((tm, tn), lambda i, j, k: (i, j))

    if jnp.dtype(out_dtype) == jnp.dtype(jnp.float32):
        kernel = _ensemble_kernel_f32
        scratch = []                                       # accumulate in o_ref itself
    else:
        kernel = _ensemble_kernel_cast
        scratch = [pltpu.VMEM((tm, tn), jnp.float32)]      # f32 acc, narrow writeback

    # VMEM budget: ~3/4 of this chip's capacity (96 MiB on v5e/v6e, 48 MiB on v7x).
    try:
        vmem_cap = pltpu.get_tpu_info().vmem_capacity_bytes
    except Exception:
        vmem_cap = 64 * 1024 * 1024
    vmem_limit = int(vmem_cap * 3 // 4)

    out_p = pl.pallas_call(
        kernel,
        out_shape=jax.ShapeDtypeStruct((Bp, Dp), out_dtype),
        grid_spec=pltpu.PrefetchScalarGridSpec(
            num_scalar_prefetch=0,
            grid=grid,
            in_specs=in_specs,
            out_specs=out_spec,
            scratch_shapes=scratch,
        ),
        compiler_params=pltpu.CompilerParams(
            dimension_semantics=("parallel", "parallel", "arbitrary"),
            vmem_limit_bytes=vmem_limit,
        ),
    )(x_p, w_p, c_p)

    if Bp == B and Dp == D:
        return out_p            # no padded-output round trip in the common case
    return out_p[:B, :D]


def additive_ensemble_ref(x, init_output, W, b):
    """Pure-JAX reference mirroring the PyTorch module exactly (f32)."""
    out = jnp.broadcast_to(init_output[None, :], (x.shape[0], init_output.shape[0]))
    for e in range(W.shape[0]):
        out = out + x @ W[e] + b[e]
    return out


if __name__ == "__main__":
    key = jax.random.PRNGKey(0)
    B, F, D, E = 8, 32, 16, 3  # batch, in_features, out_dim, num estimators

    k_x, k_init, k_w, k_b = jax.random.split(key, 4)
    x = jax.random.normal(k_x, (B, F), dtype=jnp.float32)
    init_output = jax.random.normal(k_init, (D,), dtype=jnp.float32)
    W = jax.random.normal(k_w, (E, F, D), dtype=jnp.float32) * 0.1
    b = jax.random.normal(k_b, (E, D), dtype=jnp.float32) * 0.1

    out = additive_ensemble(x, init_output, W, b)
    out = jax.block_until_ready(out)

    ref = additive_ensemble_ref(x, init_output, W, b)
    assert out.shape == (B, D)
    assert out.dtype == jnp.float32
    # bf16 operand rounding (f32 accumulation) -> loosened tolerance vs f32 ref.
    assert jnp.allclose(out, ref, atol=5e-2, rtol=5e-2)

    print("KERNEL_OK")
</pallas_src>

<mosaic_0001>
module attributes {stable_mosaic.version = 11 : i64} {
  func.func @_ensemble_kernel_f32(%arg0: i32, %arg1: i32, %arg2: i32, %arg3: memref<8x32xbf16, #tpu.memory_space<vmem>>, %arg4: memref<32x16xbf16, #tpu.memory_space<vmem>>, %arg5: memref<1x16xf32, #tpu.memory_space<vmem>>, %arg6: memref<8x16xf32, #tpu.memory_space<vmem>>) attributes {dimension_semantics = [#tpu.dimension_semantics<parallel>, #tpu.dimension_semantics<parallel>, #tpu.dimension_semantics<arbitrary>], iteration_bounds = array<i64: 1, 1, 1>, scalar_prefetch = 0 : i64, scratch_operands = 0 : i64, tpu.core_type = #tpu.core_type<tc>, window_params = [{transform_indices = @transform_0, window_bounds = array<i64: 8, 32>}, {transform_indices = @transform_1, window_bounds = array<i64: 32, 16>}, {transform_indices = @transform_2, window_bounds = array<i64: 1, 16>}, {transform_indices = @transform_3, window_bounds = array<i64: 8, 16>}]} {
    %c0 = arith.constant 0 : index
    %c0_0 = arith.constant 0 : index
    %0 = vector.load %arg3[%c0, %c0_0] : memref<8x32xbf16, #tpu.memory_space<vmem>>, vector<8x32xbf16>
    %c0_1 = arith.constant 0 : index
    %c0_2 = arith.constant 0 : index
    %1 = vector.load %arg4[%c0_1, %c0_2] : memref<32x16xbf16, #tpu.memory_space<vmem>>, vector<32x16xbf16>
    %cst = arith.constant dense<0.000000e+00> : vector<8x16xf32>
    %2 = tpu.matmul %0, %1, %cst {dimension_numbers = #tpu.dot_dimension_numbers<[1], [0], [0], [1], [0, 0, 1, 1], [], []>} : vector<8x32xbf16>, vector<32x16xbf16>, vector<8x16xf32> -> vector<8x16xf32>
    %c0_i32 = arith.constant 0 : i32
    %3 = arith.cmpi eq, %arg2, %c0_i32 : i32
    %4 = arith.extui %3 : i1 to i32
    %c0_i32_3 = arith.constant 0 : i32
    %5 = arith.cmpi ne, %4, %c0_i32_3 : i32
    scf.if %5 {
      %c0_6 = arith.constant 0 : index
      %c0_7 = arith.constant 0 : index
      %9 = vector.load %arg5[%c0_6, %c0_7] : memref<1x16xf32, #tpu.memory_space<vmem>>, vector<1x16xf32>
      %10 = vector.broadcast %9 : vector<1x16xf32> to vector<8x16xf32>
      %11 = arith.addf %10, %2 : vector<8x16xf32>
      %c0_8 = arith.constant 0 : index
      %c0_9 = arith.constant 0 : index
      %12 = vector.load %arg6[%c0_8, %c0_9] : memref<8x16xf32, #tpu.memory_space<vmem>>, vector<8x16xf32>
      tpu.vector_store %arg6[%c0_8, %c0_9], %11 {strides = array<i32>} : memref<8x16xf32, #tpu.memory_space<vmem>>, vector<8x16xf32>,
    } else {
    }
    %c0_i32_4 = arith.constant 0 : i32
    %6 = arith.cmpi ne, %arg2, %c0_i32_4 : i32
    %7 = arith.extui %6 : i1 to i32
    %c0_i32_5 = arith.constant 0 : i32
    %8 = arith.cmpi ne, %7, %c0_i32_5 : i32
    scf.if %8 {
      %c0_6 = arith.constant 0 : index
      %c0_7 = arith.constant 0 : index
      %9 = vector.load %arg6[%c0_6, %c0_7] : memref<8x16xf32, #tpu.memory_space<vmem>>, vector<8x16xf32>
      %10 = arith.addf %9, %2 : vector<8x16xf32>
      %c0_8 = arith.constant 0 : index
      %c0_9 = arith.constant 0 : index
      %11 = vector.load %arg6[%c0_8, %c0_9] : memref<8x16xf32, #tpu.memory_space<vmem>>, vector<8x16xf32>
      tpu.vector_store %arg6[%c0_8, %c0_9], %10 {strides = array<i32>} : memref<8x16xf32, #tpu.memory_space<vmem>>, vector<8x16xf32>,
    } else {
    }
    return
  }
  func.func @transform_0(%arg0: i32, %arg1: i32, %arg2: i32) -> (i32, i32) {
    %c0_i32 = arith.constant 0 : i32
    return %arg0, %arg2 : i32, i32
  }
  func.func @transform_1(%arg0: i32, %arg1: i32, %arg2: i32) -> (i32, i32) {
    %c0_i32 = arith.constant 0 : i32
    return %arg2, %arg1 : i32, i32
  }
  func.func @transform_2(%arg0: i32, %arg1: i32, %arg2: i32) -> (i32, i32) {
    %c0_i32 = arith.constant 0 : i32
    %c0_i32_0 = arith.constant 0 : i32
    return %c0_i32, %arg1 : i32, i32
  }
  func.func @transform_3(%arg0: i32, %arg1: i32, %arg2: i32) -> (i32, i32) {
    %c0_i32 = arith.constant 0 : i32
    return %arg0, %arg1 : i32, i32
  }
}

</mosaic_0001>

<bundles_post_ra>
// kernel: tpu_custom_call.1
= control target key start
LH: loop header
LB: loop body
LE: loop exit
PB: predicated region body
PF: predicated region fallthrough
CT: control target
= control target key end

     0   :  { %v157_v1 = vmov 0.0   ;;  %vm158_vm0 = vmmov 0   ;;  %s204_s0 = inlined_call_operand.vmem [shape: bf16[8,32], index: 0, kind: input, shape index: {}]   ;;  %s205_s1 = inlined_call_operand.vmem [shape: bf16[32,16], index: 1, kind: input, shape index: {}]   ;;  %s206_s2 = inlined_call_operand.vmem [shape: f32[1,16], index: 2, kind: input, shape index: {}]   ;;  %s207_s3 = inlined_call_operand.hbm [shape: f32[8,16], index: 3, kind: output, shape index: {}]  }
   0x1   :  { %v131_v0 = vld [vmem:[%s205_s1] sm:$0xff]   ;;  %120 = vmatprep.subr.bf16.mxu0 %v157_v1  ;;  %v132_v2 = vld [vmem:[%s205_s1 + $0x8] sm:$0xff]   ;;  %124 = vmatprep.mubr.msk.bf16.mxu0 %vm158_vm0, %v157_v1 }
   0x2   :  { %121 = vmatpush3.bf16.msra.mxu0 %v131_v0 }
   0x3   :  { %8 = vsyncpa [#allocation3], 0  ;;  %122 = vmatprep.subr.bf16.mxu0 %v157_v1  ;;  %v16_v3 = vld [vmem:[%s204_s0] sm:$0xf]  ;;  %vm33_vm1 = vcmask 261120   ;;  %s159_s20 = smov [#allocation2]  }
   0x4   :  { %v116_v4 = vld [vmem:[%s206_s2] ss:$0 sm:$0xff]  ;;  %s105_s21 = sshll.u32 %s159_s20, 4  ;;  %vm89_vm2 = vcmask 130048   ;;  %s106_s21 = int_to_ptr.vmem [resolvable:$true] %s105_s21 }
   0x5   :  { %s133_s1 = scalar_lea.vmem %s106_s21, 128  ;;  %p138_p1 = scmp.lt.s32.totalorder %s106_s21, %s106_s21 }
   0x6   :  { %123 = vmatpush3.bf16.msra.mxu0 %v132_v2  ;;  %p134_p0 = scmp.ne.s32.totalorder %s106_s21, %s133_s1  ;;  %p139_p2 = scmp.lt.s32.totalorder %s133_s1, %s133_s1 }
   0x8   :  { %p140_p3 = por %p139_p2, %p138_p1 }
   0x9   :  { %125 = vmatmul.mubr.msk.bf16.vlgmr.msra.gmra.mrb[0].mxu0 %vm33_vm1, %v16_v3 }
   0xa   :  { %p141_p4 = pnand %p140_p3, %p134_p0 }
  0xdc   :  { %v71_v5 = vpop.f32.mrb[0].mxu0 }
  0xdd   :  { %v88_v6 = vadd.f32 %v116_v4, %v71_v5  ;;  %v126_v7 = vpop.f32.mrb[1].mxu0 }
  0xde   :  { %v74_v8 = vpop.f32.mrb[2].mxu0 }
  0xdf   :  { %v127_v9 = vpop.f32.mrb[3].mxu0  ;;  %90 = vst.msk [vmem:[#allocation2] sm:$0xff] %vm89_vm2, %v88_v6 }
  0xe0   :  { %144 = shalt.err (!%p141_p4)
}
  0xe1   :  { %s145_s2 = scalar_lea.hbm %s207_s3, 128 }
  0xe2   :  { %p146_p5 = scmp.ne.s32.totalorder %s207_s3, %s145_s2  ;;  %p149_p6 = scmp.lt.u32.totalorder %s145_s2, %s207_s3 }
  0xe4   :  { %p151_p7 = pnand %p149_p6, %p146_p5 }
  0xe6   :  { %154 = shalt.err (!%p151_p7)
}
  0xe7   :  { %108 = dma.vmem_to_hbm [thread:$0]  %s106_s21, 128, %s207_s3, [#allocation3]  }
  0xe8   :  { %155 = dma.done.wait [#allocation3], 128  }
  0xe9   :  { %156 = vsyncadd [#allocation3], 4294967168 }
  0xea   :  { %112 = vsyncpa [#allocation3], 1 }

</bundles_post_ra>
